<compile_context>
chip_gen: v7x
topology: tpu7x:2x2x1
jax: 0.10.0
libtpu: 0.0.40
codegen_flags: <defaults>
</compile_context>

<pallas_src>
import math
import functools

import jax
import jax.numpy as jnp
from jax.experimental import pallas as pl
from jax.experimental.pallas import tpu as pltpu


_TARGET_BLOCK_BYTES = 6 << 20    # ~6 MiB per x block (per perf review)
_VMEM_LIMIT_BYTES = 48 << 20     # raised scoped-VMEM limit (fits v7x's 64 MiB)


# --------------------------------------------------------------------------
# PE table (wrapper-side, constant-folded under jit; matches torch buffer)
# --------------------------------------------------------------------------
def _sinusoidal_pe(seq_len, dim):
    position = jnp.arange(seq_len, dtype=jnp.float32)[:, None]
    div_term = jnp.exp(jnp.arange(0, dim, 2, dtype=jnp.float32)
                       * (-math.log(10000.0) / dim))
    pe = jnp.zeros((seq_len, dim), jnp.float32)
    pe = pe.at[:, 0::2].set(jnp.sin(position * div_term))
    pe = pe.at[:, 1::2].set(jnp.cos(position * div_term))
    return pe


# --------------------------------------------------------------------------
# Pallas kernel: memory-bound add of a VMEM-resident PE block
# --------------------------------------------------------------------------
def _pe_add_kernel(pe_ref, x_ref, o_ref):
    """pe_ref: (rows_blk, dim) f32, same block for every grid step (resident).
    x_ref / o_ref: (rows_blk, dim)."""
    x = x_ref[...].astype(jnp.float32)
    o_ref[...] = (x + pe_ref[...]).astype(o_ref.dtype)


def _pick_rows_block(R, P, dim, itemsize, target_bytes=_TARGET_BLOCK_BYTES):
    """Rows per grid step.

    Constraints / preferences:
      * multiple of P   -> the resident PE tile pattern is identical per block
      * multiple of 8   -> dense sublane tiling (no padding when P < 8)
      * block bytes <= target (so in+out double buffers + PE stay well under
        the scoped VMEM limit on all generations)
      * >= 2 grid steps when possible (megacore on v7x, DMA/compute overlap)
      * prefer even division, then the largest block.
    """
    lcm = P * 8 // math.gcd(P, 8)
    bytes_per_row = max(1, dim * itemsize)
    cap = max(lcm, (target_bytes // bytes_per_row) // lcm * lcm)
    if R <= lcm:
        return R                      # tiny problem: whole thing, one step
    best = None
    rb = lcm
    limit = min(cap, R)
    while rb <= limit:
        steps = -(-R // rb)
        if steps >= 2:
            key = (R % rb == 0, rb)   # prefer even division, then bigger
            if best is None or key > best[1]:
                best = (rb, key)
        rb += lcm
    return best[0] if best is not None else min(R, cap)


def _pe_add_pallas(x_flat, pe_tile):
    """x_flat: (R, dim); pe_tile: (rows_blk, dim) f32 (PE tiled to one block).
    Returns x_flat + PE (broadcast over batch), promoted to f32 like torch."""
    R, dim = x_flat.shape
    rows_blk = pe_tile.shape[0]
    out_dtype = jnp.promote_types(x_flat.dtype, pe_tile.dtype)
    grid = (pl.cdiv(R, rows_blk),)
    return pl.pallas_call(
        _pe_add_kernel,
        out_shape=jax.ShapeDtypeStruct((R, dim), out_dtype),
        grid=grid,
        in_specs=[
            # PE: constant block index -> DMA'd once, VMEM-resident.
            pl.BlockSpec((rows_blk, dim), lambda r: (0, 0)),
            # x: lane-dense (rows_blk, dim) blocks; producer (the wrapper
            # transpose/reshape) may be fused into this operand by XLA.
            pl.BlockSpec((rows_blk, dim), lambda r: (r, 0)),
        ],
        out_specs=pl.BlockSpec((rows_blk, dim), lambda r: (r, 0)),
        compiler_params=pltpu.CompilerParams(
            dimension_semantics=("parallel",),
            vmem_limit_bytes=_VMEM_LIMIT_BYTES,
            allow_input_fusion=[False, True],
        ),
    )(pe_tile, x_flat)


# --------------------------------------------------------------------------
# Partition / DiTPatchPartitioner forward
# --------------------------------------------------------------------------
def partition_forward(x, *, patch_size, dim, num_patches, batch_size, N_s=4,
                      max_len=5000):
    """Equivalent of Partition.forward.  x: [B, C, T, D]."""
    B, C, T, D = x.shape
    assert T % num_patches == 0, "Time frames must be divisible by num_patches."
    assert T == patch_size * num_patches, "patch_size * num_patches must equal T."
    assert patch_size * D * C == dim, "patch_size*D*C must equal dim."
    assert num_patches <= max_len, "Sequence length exceeds PE max_len."
    assert B == batch_size * N_s, "Leading dim must equal batch_size * N_s."

    P = num_patches
    R = B * P

    # Layout glue: [B,C,T,D] -> [B,T,D,C] -> [B*P, dim].  With
    # allow_input_fusion this producer can be fused into the pallas_call
    # input, avoiding a second full HBM pass over the tensor.
    x_flat = jnp.transpose(x, (0, 2, 3, 1)).reshape(R, dim)

    out_dtype = jnp.promote_types(x.dtype, jnp.float32)
    rows_blk = _pick_rows_block(R, P, dim, jnp.dtype(out_dtype).itemsize)

    pe = _sinusoidal_pe(P, dim)                        # (P, dim) f32, constant
    pe_tile = jnp.tile(pe, (rows_blk // P, 1))         # exactly one block

    out = _pe_add_pallas(x_flat, pe_tile)              # hot path in Pallas

    # final view(batch_size, N_s*num_patches, -1)
    return out.reshape(batch_size, N_s * P, dim)


def dit_patch_partitioner_forward(z_s, s, *, batch_size,
                                  z_patch_size, z_num_patches, z_dim,
                                  s_patch_size, s_num_patches, s_dim,
                                  N_s=4, max_len=5000):
    z_m = partition_forward(z_s, patch_size=z_patch_size, dim=z_dim,
                            num_patches=z_num_patches, batch_size=batch_size,
                            N_s=N_s, max_len=max_len)
    s_c = partition_forward(s, patch_size=s_patch_size, dim=s_dim,
                            num_patches=s_num_patches, batch_size=batch_size,
                            N_s=N_s, max_len=max_len)
    return z_m, s_c


# ---------------- pure-JAX reference (for correctness check) ----------------
def _partition_ref(x, num_patches, batch_size, N_s=4):
    B, C, T, D = x.shape
    dim = (T // num_patches) * D * C
    xp = jnp.transpose(x, (0, 2, 3, 1)).reshape(B, num_patches, dim)
    xp = xp.astype(jnp.float32) + _sinusoidal_pe(num_patches, dim)[None]
    return xp.reshape(batch_size, N_s * num_patches, dim)


if __name__ == "__main__":
    # Small, consistent config:
    #   batch_size=2, N_s=4  -> B = 8
    #   z: C=4, T=8, D=16, patch=2, num_patches=4 -> z_dim = 2*16*4 = 128
    #   s: C=4, T=8, D=32, patch=2, num_patches=4 -> s_dim = 2*32*4 = 256
    batch_size, N_s = 2, 4
    B = batch_size * N_s
    z_patch, z_np, z_C, z_D = 2, 4, 4, 16
    s_patch, s_np, s_C, s_D = 2, 4, 4, 32
    z_dim = z_patch * z_D * z_C
    s_dim = s_patch * s_D * s_C
    T = z_patch * z_np  # 8

    key = jax.random.PRNGKey(0)
    kz, ks = jax.random.split(key)
    z_s = jax.random.normal(kz, (B, z_C, T, z_D), dtype=jnp.float32)
    s = jax.random.normal(ks, (B, s_C, T, s_D), dtype=jnp.float32)

    fwd = functools.partial(
        dit_patch_partitioner_forward,
        batch_size=batch_size,
        z_patch_size=z_patch, z_num_patches=z_np, z_dim=z_dim,
        s_patch_size=s_patch, s_num_patches=s_np, s_dim=s_dim,
        N_s=N_s, max_len=64,
    )

    z_m, s_c = jax.jit(fwd)(z_s, s)
    jax.block_until_ready((z_m, s_c))

    # sanity checks vs pure-JAX reference
    z_ref = _partition_ref(z_s, z_np, batch_size, N_s)
    s_ref = _partition_ref(s, s_np, batch_size, N_s)
    assert z_m.shape == (batch_size, N_s * z_np, z_dim)
    assert s_c.shape == (batch_size, N_s * s_np, s_dim)
    assert z_m.dtype == z_ref.dtype and s_c.dtype == s_ref.dtype
    assert jnp.allclose(z_m, z_ref, atol=1e-5, rtol=1e-5)
    assert jnp.allclose(s_c, s_ref, atol=1e-5, rtol=1e-5)

    print("KERNEL_OK")
</pallas_src>

<mosaic_0001>
module attributes {stable_mosaic.version = 11 : i64} {
  func.func @_pe_add_kernel(%arg0: i32, %arg1: memref<16x256xf32, #tpu.memory_space<vmem>>, %arg2: memref<16x256xf32, #tpu.memory_space<vmem>>, %arg3: memref<16x256xf32, #tpu.memory_space<vmem>>) attributes {dimension_semantics = [#tpu.dimension_semantics<parallel>], iteration_bounds = array<i64: 2>, scalar_prefetch = 0 : i64, scratch_operands = 0 : i64, tpu.core_type = #tpu.core_type<tc>, window_params = [{pipeline_mode = #tpu.pipeline_mode<synchronous>, transform_indices = @transform_0, window_bounds = array<i64: 16, 256>}, {transform_indices = @transform_1, window_bounds = array<i64: 16, 256>}, {transform_indices = @transform_2, window_bounds = array<i64: 16, 256>}]} {
    %c0 = arith.constant 0 : index
    %c0_0 = arith.constant 0 : index
    %0 = vector.load %arg2[%c0, %c0_0] : memref<16x256xf32, #tpu.memory_space<vmem>>, vector<16x256xf32>
    %c0_1 = arith.constant 0 : index
    %c0_2 = arith.constant 0 : index
    %1 = vector.load %arg1[%c0_1, %c0_2] : memref<16x256xf32, #tpu.memory_space<vmem>>, vector<16x256xf32>
    %2 = arith.addf %0, %1 : vector<16x256xf32>
    %c0_3 = arith.constant 0 : index
    %c0_4 = arith.constant 0 : index
    %3 = vector.load %arg3[%c0_3, %c0_4] : memref<16x256xf32, #tpu.memory_space<vmem>>, vector<16x256xf32>
    tpu.vector_store %arg3[%c0_3, %c0_4], %2 {strides = array<i32>} : memref<16x256xf32, #tpu.memory_space<vmem>>, vector<16x256xf32>,
    return
  }
  func.func @transform_0(%arg0: i32) -> (i32, i32) {
    %c0_i32 = arith.constant 0 : i32
    %c0_i32_0 = arith.constant 0 : i32
    %c0_i32_1 = arith.constant 0 : i32
    return %c0_i32, %c0_i32_0 : i32, i32
  }
  func.func @transform_1(%arg0: i32) -> (i32, i32) {
    %c0_i32 = arith.constant 0 : i32
    %c0_i32_0 = arith.constant 0 : i32
    return %arg0, %c0_i32 : i32, i32
  }
  func.func @transform_2(%arg0: i32) -> (i32, i32) {
    %c0_i32 = arith.constant 0 : i32
    %c0_i32_0 = arith.constant 0 : i32
    return %arg0, %c0_i32 : i32, i32
  }
}

module attributes {stable_mosaic.version = 11 : i64} {
  func.func @_pe_add_kernel(%arg0: i32, %arg1: memref<16x128xf32, #tpu.memory_space<vmem>>, %arg2: memref<16x128xf32, #tpu.memory_space<vmem>>, %arg3: memref<16x128xf32, #tpu.memory_space<vmem>>) attributes {dimension_semantics = [#tpu.dimension_semantics<parallel>], iteration_bounds = array<i64: 2>, scalar_prefetch = 0 : i64, scratch_operands = 0 : i64, tpu.core_type = #tpu.core_type<tc>, window_params = [{pipeline_mode = #tpu.pipeline_mode<synchronous>, transform_indices = @transform_0, window_bounds = array<i64: 16, 128>}, {transform_indices = @transform_1, window_bounds = array<i64: 16, 128>}, {transform_indices = @transform_2, window_bounds = array<i64: 16, 128>}]} {
    %c0 = arith.constant 0 : index
    %c0_0 = arith.constant 0 : index
    %0 = vector.load %arg2[%c0, %c0_0] : memref<16x128xf32, #tpu.memory_space<vmem>>, vector<16x128xf32>
    %c0_1 = arith.constant 0 : index
    %c0_2 = arith.constant 0 : index
    %1 = vector.load %arg1[%c0_1, %c0_2] : memref<16x128xf32, #tpu.memory_space<vmem>>, vector<16x128xf32>
    %2 = arith.addf %0, %1 : vector<16x128xf32>
    %c0_3 = arith.constant 0 : index
    %c0_4 = arith.constant 0 : index
    %3 = vector.load %arg3[%c0_3, %c0_4] : memref<16x128xf32, #tpu.memory_space<vmem>>, vector<16x128xf32>
    tpu.vector_store %arg3[%c0_3, %c0_4], %2 {strides = array<i32>} : memref<16x128xf32, #tpu.memory_space<vmem>>, vector<16x128xf32>,
    return
  }
  func.func @transform_0(%arg0: i32) -> (i32, i32) {
    %c0_i32 = arith.constant 0 : i32
    %c0_i32_0 = arith.constant 0 : i32
    %c0_i32_1 = arith.constant 0 : i32
    return %c0_i32, %c0_i32_0 : i32, i32
  }
  func.func @transform_1(%arg0: i32) -> (i32, i32) {
    %c0_i32 = arith.constant 0 : i32
    %c0_i32_0 = arith.constant 0 : i32
    return %arg0, %c0_i32 : i32, i32
  }
  func.func @transform_2(%arg0: i32) -> (i32, i32) {
    %c0_i32 = arith.constant 0 : i32
    %c0_i32_0 = arith.constant 0 : i32
    return %arg0, %c0_i32 : i32, i32
  }
}

</mosaic_0001>

<bundles_post_ra>
// kernel: tile.19
= control target key start
LH: loop header
LB: loop body
LE: loop exit
PB: predicated region body
PF: predicated region fallthrough
CT: control target
= control target key end

     0   :  { %s148_s0 = inlined_call_operand.vmem [shape: f32[4,4,256], index: 0, kind: input, shape index: {}]   ;;  %s149_s1 = inlined_call_operand.vmem [shape: f32[16,256], index: 1, kind: output, shape index: {}]  }
   0x1   :  { %v76_v0 = vld [vmem:[%s148_s0 + $0x1c] sm:$0xf]  ;;  %v77_v1 = vld [vmem:[%s148_s0 + $0x18] sm:$0xf]  ;;  %v78_v2 = vld [vmem:[%s148_s0 + $0x14] sm:$0xf] }
   0x2   :  { %8 = vst [vmem:[#allocation0 + $0x38] sm:$0xf] %v76_v0  ;;  %13 = vst [vmem:[#allocation0 + $0x30] sm:$0xf] %v77_v1  ;;  %v79_v3 = vld [vmem:[%s148_s0 + $0x10] sm:$0xf] }
   0x3   :  { %18 = vst [vmem:[#allocation0 + $0x28] sm:$0xf] %v78_v2  ;;  %v80_v4 = vld [vmem:[%s148_s0 + $0xc] sm:$0xf]  ;;  %v81_v5 = vld [vmem:[%s148_s0 + $0x8] sm:$0xf] }
   0x4   :  { %23 = vst [vmem:[#allocation0 + $0x20] sm:$0xf] %v79_v3  ;;  %28 = vst [vmem:[#allocation0 + $0x18] sm:$0xf] %v80_v4  ;;  %v82_v6 = vld [vmem:[%s148_s0 + $0x4] sm:$0xf] }
   0x5   :  { %33 = vst [vmem:[#allocation0 + $0x10] sm:$0xf] %v81_v5  ;;  %v38_v7 = vld [vmem:[%s148_s0] sm:$0xf]  ;;  %37 = vst [vmem:[#allocation0 + $0x8] sm:$0xf] %v82_v6 }
   0x6   :  { %39 = vst [vmem:[#allocation0] sm:$0xf] %v38_v7 }
   0x9   :  { %v63_v9 = vld [vmem:[#allocation0 + $0x30] sm:$0xf]   ;;  %v67_v10 = vld [vmem:[#allocation0 + $0x38] sm:$0xf]  }
   0xa   :  { %v59_v8 = vld [vmem:[#allocation0 + $0x28] sm:$0xf]   ;;  %88 = vst [vmem:[%s149_s1 + $0x14] sm:$0xf] %v63_v9   ;;  %89 = vst [vmem:[%s149_s1 + $0x1c] sm:$0xf] %v67_v10  }
   0xb   :  { %v51_v12 = vld [vmem:[#allocation0 + $0x18] sm:$0xf]   ;;  %v55_v13 = vld [vmem:[#allocation0 + $0x20] sm:$0xf]   ;;  %87 = vst [vmem:[%s149_s1 + $0x18] sm:$0xf] %v59_v8  }
   0xc   :  { %v47_v11 = vld [vmem:[#allocation0 + $0x10] sm:$0xf]   ;;  %v43_v15 = vld [vmem:[#allocation0 + $0x8] sm:$0xf]   ;;  %85 = vst [vmem:[%s149_s1 + $0xc] sm:$0xf] %v51_v12  }
   0xd   :  { %v40_v14 = vld [vmem:[#allocation0] sm:$0xf]   ;;  %84 = vst [vmem:[%s149_s1 + $0x4] sm:$0xf] %v47_v11   ;;  %86 = vst [vmem:[%s149_s1 + $0x10] sm:$0xf] %v55_v13  }
   0xe   :  { %41 = vst [vmem:[%s149_s1] sm:$0xf] %v40_v14   ;;  %83 = vst [vmem:[%s149_s1 + $0x8] sm:$0xf] %v43_v15  }

// kernel: dit_patch_partitioner_forward.3
= control target key start
LH: loop header
LB: loop body
LE: loop exit
PB: predicated region body
PF: predicated region fallthrough
CT: control target
= control target key end

     0   :  { %7 = vsyncpa [#allocation3], 0  ;;  %s495_s0 = inlined_call_operand.vmem [shape: f32[16,256], index: 0, kind: input, shape index: {}]   ;;  %s496_s1 = inlined_call_operand.vmem [shape: f32[32,256], index: 1, kind: input, shape index: {}]   ;;  %s497_s2 = inlined_call_operand.hbm [shape: f32[32,256], index: 2, kind: output, shape index: {}]  }
   0x1   :  { %9 = vsyncpa [#allocation3 + $0x1], 0  ;;  %s381_s9 = smov 0   ;;  %s383_s10 = smov 0  }
   0x2   :  { %s385_s11 = smov 0   ;;  %s387_s12 = smov 0  }
   0x3 LB: > { %s402_s13 = sadd.s32 4294967295, %s361_s12   ;;  %s241_s14 = sadd.s32 4294967294, %s361_s12   ;;  %s361_s12 = sphi %s387_s12, %s503_s12   ;;  %s357_s11 = sphi %s385_s11, %s502_s11   ;;  %s353_s10 = sphi %s383_s10, %s501_s10   ;;  %s349_s9 = sphi %s381_s9, %s500_s9  }
   0x4   : > { %s406_s15 = sadd.s32 1, %s361_s12   ;;  %s69_s16 = sadd.s32 1, %s357_s11 }
   0x5   : > { %s66_s17 = ssub.s32 %s361_s12, %s406_s15  ;;  %p79_p0 = scmp.ne.s32.totalorder %s357_s11, %s353_s10 }
   0x6   : > { %p67_p1 = scmp.eq.s32.totalorder %s66_s17, 0  ;;  %p80_p2 = scmp.eq.s32.totalorder %s402_s13, 1 }
   0x7   : > { %p85_p3 = scmp.ne.s32.totalorder %s353_s10, %s349_s9  ;;  %p86_p4 = scmp.eq.s32.totalorder %s241_s14, 1 }
   0x8   : > { %s417_s18 = scalar_select %p67_p1, %s357_s11, %s69_s16  }
   0x9   : > { %p419_p5 = por %p80_p2, %p79_p0  ;;  %p423_p6 = por %p86_p4, %p85_p3 }
   0xa   : > { %p244_p7 = scmp.ge.s32.totalorder %s361_s12, 1  ;;  %p117_p8 = scmp.lt.s32.totalorder %s361_s12, 3 }
   0xc   : > { %p118_p9 = pnand %p244_p7, %p117_p8 }
   0xd   : > { %s137_s21 = sand.u32 (!%p118_p9), 1, %s353_s10   ;;  %s246_s22 = sshll.u32 (!%p118_p9), %s402_s13, 1  ;;  %v152_v0 = vld [vmem:[%s495_s0] sm:$0xff] (!%p118_p9)  ;;  %v153_v1 = vld [vmem:[%s495_s0 + $0x8] sm:$0xff] (!%p118_p9)  ;;  %v154_v2 = vld [vmem:[%s495_s0 + $0x10] sm:$0xff] (!%p118_p9) }
   0xe   : > { %121 = sbr.rel (%p118_p9) target bundleno = 46 (0x2e), region = 28  ;;  %s245_s23 = sshll.u32 (!%p118_p9), %s137_s21, 5  ;;  %v155_v3 = vld [vmem:[%s495_s0 + $0x18] sm:$0xff] (!%p118_p9) }
   0xf   : > { %p141_p10 = scmp.lt.s32.totalorder (!%p118_p9), %s246_s22, 3  ;;  %s139_s24 = scalar_lea.vmem (!%p118_p9), [#allocation2], %s245_s23 }
  0x10   : > { %s179_s25 = sshll.u32 (!%p118_p9), %s139_s24, 4  ;;  %s257_s5 = sshll.u32 (!%p118_p9), %s402_s13, 9  ;;  %s447_s25 = int_to_ptr.vmem [resolvable:$true] %s179_s25 }
  0x11   : > { %s454_s23 = scalar_lea.sflag (!%p118_p9), [#allocation3], %s137_s21  ;;  %s363_s27 = smov (!%p118_p9), [#allocation2]  }
  0x12   : > { %s303_s28 = sshll.u32 (!%p118_p9), %s363_s27, 4  ;;  %s304_s28 = int_to_ptr.vmem [resolvable:$false] %s303_s28 }
  0x13   : > { %s305_s29 = scalar_lea.vmem (!%p118_p9), %s304_s28, 1024  ;;  %p306_p0 = scmp.lt.s32.totalorder (!%p118_p9), %s447_s25, %s304_s28 }
  0x15   : > { %s505_s22 = smov (!%p141_p10, %s246_s22), 3 }
  0x16   : > { %s255_s26 = sshll.u32 %s505_s22, 4  ;;  %s452_s22 = scalar_lea.hbm %s497_s2, %s257_s5 }
  0x17   : > { %s145_s8 = scalar_lea.vmem %s496_s1, %s255_s26  ;;  %s299_s26 = scalar_lea.vmem %s447_s25, 512 }
  0x18   : > { %v148_v4 = vld [vmem:[%s145_s8] sm:$0xff]  ;;  %v149_v5 = vld [vmem:[%s145_s8 + $0x8] sm:$0xff]  ;;  %v150_v6 = vld [vmem:[%s145_s8 + $0x10] sm:$0xff]  ;;  %p300_p11 = scmp.ne.s32.totalorder %s447_s25, %s299_s26  ;;  %p307_p1 = scmp.lt.s32.totalorder %s305_s29, %s299_s26 }
  0x19   : > { %v156_v7 = vadd.f32 %v152_v0, %v148_v4  ;;  %v157_v8 = vadd.f32 %v153_v1, %v149_v5  ;;  %v158_v9 = vadd.f32 %v154_v2, %v150_v6  ;;  %v151_v10 = vld [vmem:[%s145_s8 + $0x18] sm:$0xff] }
  0x1a   : > { %v159_v11 = vadd.f32 %v155_v3, %v151_v10  ;;  %p301_p12 = pnand %p300_p11, %p419_p5  ;;  %p308_p2 = por %p307_p1, %p306_p0 }
  0x1b   : > { %160 = vst [vmem:[%s139_s24] sm:$0xff] %v156_v7  ;;  %161 = vst [vmem:[%s139_s24 + $0x8] sm:$0xff] %v157_v8 }
  0x1c   : > { %162 = vst [vmem:[%s139_s24 + $0x10] sm:$0xff] %v158_v9  ;;  %163 = vst [vmem:[%s139_s24 + $0x18] sm:$0xff] %v159_v11  ;;  %p302_p13 = pneg %p301_p12 }
  0x1e   : > { %p309_p3 = pnand %p308_p2, %p302_p13 }
  0x20   : > { %312 = shalt.err (!%p309_p3)
}
  0x21   : > { %s313_s21 = scalar_lea.hbm %s452_s22, 512  ;;  %s317_s3 = scalar_lea.hbm %s497_s2, 1024 }
  0x22   : > { %p314_p4 = scmp.ne.s32.totalorder %s452_s22, %s313_s21  ;;  %p318_p9 = scmp.lt.u32.totalorder %s452_s22, %s497_s2 }
  0x23   : > { %p319_p10 = scmp.lt.u32.totalorder %s317_s3, %s313_s21  ;;  %p321_p12 = scmp.lt.u32.totalorder %s313_s21, %s452_s22 }
  0x24   : > { %p315_p7 = pnand %p314_p4, %p419_p5 }
  0x25   : > { %p320_p11 = por %p319_p10, %p318_p9 }
  0x26   : > { %p316_p8 = pneg %p315_p7 }
  0x27   : > { %p322_p13 = por %p321_p12, %p320_p11 }
  0x29   : > { %p323_p0 = pnand %p322_p13, %p316_p8 }
  0x2b   : > { %326 = shalt.err (!%p323_p0)
}
  0x2c   : > { %s364_s6 = smov 256   ;;  %s365_s7 = smov 16  }
  0x2d   : > { %258 = dma.vmem_to_hbm [thread:$0]  (%p419_p5), %s447_s25, 512, %s452_s22, %s454_s23, %s364_s6, %s364_s6, %s365_s7  }
  0x2e PF: > { %p264_p1 = scmp.ge.s32.totalorder %s361_s12, 2  ;;  %s194_s8 = sand.u32 1, %s349_s9  }
  0x2f   : > { %s195_s14 = scalar_lea.sflag [#allocation3], %s194_s8 }
  0x30   : > { %p261_p2 = pnand %p264_p1, %p423_p6 }
  0x32   : > { %344 = dma.done.wait (!%p261_p2), %s195_s14, 512  }
  0x33   : > { %346 = vsyncadd (!%p261_p2), %s195_s14, 4294966784  ;;  %p12_p3 = scmp.ge.s32.totalorder %s406_s15, 4   ;;  %s500_s9 = smov %s353_s10 }
  0x34   : > { %s501_s10 = smov %s357_s11  ;;  %s502_s11 = smov %s417_s18 }
  0x35   : > { %s503_s12 = smov %s406_s15  ;;  %14 = sbr.rel (!%p12_p3) target bundleno = 3 (0x3), region = 63 }
  0x3c   :  { %200 = vsyncpa [#allocation3], 1 }
  0x3d   :  { %202 = vsyncpa [#allocation3 + $0x1], 1 }

// kernel: dit_patch_partitioner_forward.2
= control target key start
LH: loop header
LB: loop body
LE: loop exit
PB: predicated region body
PF: predicated region fallthrough
CT: control target
= control target key end

     0   :  { %7 = vsyncpa [#allocation3], 0  ;;  %s473_s0 = inlined_call_operand.vmem [shape: f32[16,128], index: 0, kind: input, shape index: {}]   ;;  %s474_s1 = inlined_call_operand.vmem [shape: f32[32,128], index: 1, kind: input, shape index: {}]   ;;  %s475_s2 = inlined_call_operand.hbm [shape: f32[32,128], index: 2, kind: output, shape index: {}]  }
   0x1   :  { %9 = vsyncpa [#allocation3 + $0x1], 0  ;;  %s365_s9 = smov 0   ;;  %s367_s10 = smov 0  }
   0x2   :  { %s369_s11 = smov 0   ;;  %s371_s12 = smov 0  }
   0x3 LB: > { %s386_s13 = sadd.s32 4294967295, %s345_s12   ;;  %s229_s14 = sadd.s32 4294967294, %s345_s12   ;;  %s345_s12 = sphi %s371_s12, %s481_s12   ;;  %s341_s11 = sphi %s369_s11, %s480_s11   ;;  %s337_s10 = sphi %s367_s10, %s479_s10   ;;  %s333_s9 = sphi %s365_s9, %s478_s9  }
   0x4   : > { %s390_s15 = sadd.s32 1, %s345_s12   ;;  %s69_s16 = sadd.s32 1, %s341_s11 }
   0x5   : > { %s66_s17 = ssub.s32 %s345_s12, %s390_s15  ;;  %p79_p0 = scmp.ne.s32.totalorder %s341_s11, %s337_s10 }
   0x6   : > { %p67_p1 = scmp.eq.s32.totalorder %s66_s17, 0  ;;  %p80_p2 = scmp.eq.s32.totalorder %s386_s13, 1 }
   0x7   : > { %p85_p3 = scmp.ne.s32.totalorder %s337_s10, %s333_s9  ;;  %p86_p4 = scmp.eq.s32.totalorder %s229_s14, 1 }
   0x8   : > { %s401_s18 = scalar_select %p67_p1, %s341_s11, %s69_s16  }
   0x9   : > { %p403_p5 = por %p80_p2, %p79_p0  ;;  %p407_p6 = por %p86_p4, %p85_p3 }
   0xa   : > { %p232_p7 = scmp.ge.s32.totalorder %s345_s12, 1  ;;  %p116_p8 = scmp.lt.s32.totalorder %s345_s12, 3 }
   0xc   : > { %p117_p9 = pnand %p232_p7, %p116_p8 }
   0xd   : > { %s135_s21 = sand.u32 (!%p117_p9), 1, %s337_s10   ;;  %s234_s22 = sshll.u32 (!%p117_p9), %s386_s13, 1  ;;  %v147_v0 = vld [vmem:[%s473_s0] sm:$0xff] (!%p117_p9)  ;;  %v148_v1 = vld [vmem:[%s473_s0 + $0x8] sm:$0xff] (!%p117_p9) }
   0xe   : > { %120 = sbr.rel (%p117_p9) target bundleno = 45 (0x2d), region = 28  ;;  %s233_s23 = sshll.u32 (!%p117_p9), %s135_s21, 4 }
   0xf   : > { %p139_p10 = scmp.lt.s32.totalorder (!%p117_p9), %s234_s22, 3  ;;  %s137_s24 = scalar_lea.vmem (!%p117_p9), [#allocation2], %s233_s23 }
  0x10   : > { %s167_s25 = sshll.u32 (!%p117_p9), %s137_s24, 4  ;;  %s241_s26 = sshll.u32 (!%p117_p9), %s386_s13, 8  ;;  %s425_s25 = int_to_ptr.vmem [resolvable:$true] %s167_s25 }
  0x11   : > { %s430_s13 = scalar_lea.hbm (!%p117_p9), %s475_s2, %s241_s26  ;;  %s432_s14 = scalar_lea.sflag (!%p117_p9), [#allocation3], %s135_s21 }
  0x12   : > { %s283_s16 = scalar_lea.vmem (!%p117_p9), %s425_s25, 256  ;;  %s347_s17 = smov (!%p117_p9), [#allocation2]  }
  0x13   : > { %p284_p11 = scmp.ne.s32.totalorder (!%p117_p9), %s425_s25, %s283_s16 }
  0x15   : > { %s483_s22 = smov (!%p139_p10, %s234_s22), 3  ;;  %p285_p12 = pnand %p284_p11, %p403_p5 }
  0x16   : > { %s235_s27 = sshll.u32 %s483_s22, 3  ;;  %s287_s22 = sshll.u32 %s347_s17, 4  ;;  %s288_s22 = int_to_ptr.vmem [resolvable:$false] %s287_s22 }
  0x17   : > { %s142_s6 = scalar_lea.vmem %s474_s1, %s235_s27  ;;  %p286_p13 = pneg %p285_p12 }
  0x18   : > { %v145_v2 = vld [vmem:[%s142_s6] sm:$0xff]  ;;  %v146_v3 = vld [vmem:[%s142_s6 + $0x8] sm:$0xff]  ;;  %s289_s23 = scalar_lea.vmem %s288_s22, 512  ;;  %p290_p0 = scmp.lt.s32.totalorder %s425_s25, %s288_s22 }
  0x19   : > { %v149_v4 = vadd.f32 %v147_v0, %v145_v2  ;;  %v150_v5 = vadd.f32 %v148_v1, %v146_v3  ;;  %p291_p1 = scmp.lt.s32.totalorder %s289_s23, %s283_s16 }
  0x1b   : > { %151 = vst [vmem:[%s137_s24] sm:$0xff] %v149_v4  ;;  %152 = vst [vmem:[%s137_s24 + $0x8] sm:$0xff] %v150_v5  ;;  %p292_p2 = por %p291_p1, %p290_p0 }
  0x1d   : > { %p293_p3 = pnand %p292_p2, %p286_p13 }
  0x1f   : > { %296 = shalt.err (!%p293_p3)
}
  0x20   : > { %s297_s21 = scalar_lea.hbm %s430_s13, 256  ;;  %s301_s27 = scalar_lea.hbm %s475_s2, 512 }
  0x21   : > { %p298_p4 = scmp.ne.s32.totalorder %s430_s13, %s297_s21  ;;  %p302_p9 = scmp.lt.u32.totalorder %s430_s13, %s475_s2 }
  0x22   : > { %p303_p10 = scmp.lt.u32.totalorder %s301_s27, %s297_s21  ;;  %p305_p12 = scmp.lt.u32.totalorder %s297_s21, %s430_s13 }
  0x23   : > { %p299_p7 = pnand %p298_p4, %p403_p5 }
  0x24   : > { %p304_p11 = por %p303_p10, %p302_p9 }
  0x25   : > { %p300_p8 = pneg %p299_p7 }
  0x26   : > { %p306_p13 = por %p305_p12, %p304_p11 }
  0x28   : > { %p307_p0 = pnand %p306_p13, %p300_p8 }
  0x2a   : > { %310 = shalt.err (!%p307_p0)
}
  0x2b   : > { %s348_s30 = smov 128   ;;  %s349_s3 = smov 8  }
  0x2c   : > { %242 = dma.vmem_to_hbm [thread:$0]  (%p403_p5), %s425_s25, 256, %s430_s13, %s432_s14, %s348_s30, %s348_s30, %s349_s3  }
  0x2d PF: > { %p248_p1 = scmp.ge.s32.totalorder %s345_s12, 2  ;;  %s182_s4 = sand.u32 1, %s333_s9  }
  0x2e   : > { %s183_s5 = scalar_lea.sflag [#allocation3], %s182_s4 }
  0x2f   : > { %p245_p2 = pnand %p248_p1, %p407_p6 }
  0x31   : > { %328 = dma.done.wait (!%p245_p2), %s183_s5, 256  }
  0x32   : > { %330 = vsyncadd (!%p245_p2), %s183_s5, 4294967040  ;;  %p12_p3 = scmp.ge.s32.totalorder %s390_s15, 4   ;;  %s478_s9 = smov %s337_s10 }
  0x33   : > { %s479_s10 = smov %s341_s11  ;;  %s480_s11 = smov %s401_s18 }
  0x34   : > { %s481_s12 = smov %s390_s15  ;;  %14 = sbr.rel (!%p12_p3) target bundleno = 3 (0x3), region = 63 }
  0x3b   :  { %188 = vsyncpa [#allocation3], 1 }
  0x3c   :  { %190 = vsyncpa [#allocation3 + $0x1], 1 }

</bundles_post_ra>
